<compile_context>
chip_gen: v7x
topology: tpu7x:2x2x1
jax: 0.10.0
libtpu: 0.0.40
codegen_flags: <defaults>
</compile_context>

<pallas_src>
import jax
import jax.numpy as jnp
from jax.experimental import pallas as pl
from jax.experimental.pallas import tpu as pltpu


def _round_up(x, m):
    return ((x + m - 1) // m) * m


def _reward_kernel(belief_ref, state_ref, w1b_ref, w1s_ref, b1_ref,
                   w2_ref, b2_ref, w3_ref, b3_ref, o_ref):
    # fc1 with torch.cat fused away: two MXU dots into one f32 accumulator.
    h = jnp.dot(belief_ref[...], w1b_ref[...], preferred_element_type=jnp.float32)
    h = h + jnp.dot(state_ref[...], w1s_ref[...], preferred_element_type=jnp.float32)
    h = jnp.maximum(h + b1_ref[...], 0.0)            # bias + relu in f32

    # fc2 + relu (MXU, f32 accumulation; operands in compute dtype).
    h = jnp.dot(h.astype(w2_ref.dtype), w2_ref[...],
                preferred_element_type=jnp.float32)
    h = jnp.maximum(h + b2_ref[...], 0.0)

    # fc3 (output dim 1): contract over H with the batch tile in the lane dim:
    # (1, H) @ (H, TM) -> (1, TM).  Lane-dense result -> contiguous store.
    # Standard transposed-RHS matmul pattern (same as q @ k.T); MXU is idle.
    r = jnp.dot(w3_ref[...], h.T, preferred_element_type=jnp.float32)
    r = (r + b3_ref[0]).astype(o_ref.dtype)
    o_ref[...] = r.reshape(o_ref.shape)


def reward_model_forward(belief, state, params, *, tm=8192,
                         compute_dtype=jnp.bfloat16):
    """belief: (B, belief_size), state: (B, state_size) -> reward: (B,) f32."""
    B, belief_size = belief.shape
    _, state_size = state.shape
    H = params["w1"].shape[1]

    # fc1/fc2 weights in compute dtype (tiny, resident in VMEM).  fc1's weight
    # is split so the concat never materializes.  Biases and the fc3 weight
    # row stay f32 (they feed the f32 accumulator / f32 epilogue).
    w1 = params["w1"].astype(compute_dtype)
    w1b = w1[:belief_size, :]
    w1s = w1[belief_size:, :]
    w2 = params["w2"].astype(compute_dtype)
    w3_row = jnp.reshape(params["w3"], (1, H)).astype(jnp.float32)
    b1 = jnp.reshape(params["b1"], (1, H)).astype(jnp.float32)
    b2 = jnp.reshape(params["b2"], (1, H)).astype(jnp.float32)
    b3_s = jnp.reshape(params["b3"], (1,)).astype(jnp.float32)

    # Activations in compute dtype (no-op if the producer already emits it).
    belief = belief.astype(compute_dtype)
    state = state.astype(compute_dtype)

    # Batch tile: as large as possible but with >= 2 grid steps when B allows
    # (keeps both v7x TensorCores busy); multiple of 16 (bf16/f32 sublane-safe).
    TM = min(int(tm), _round_up(max((B + 1) // 2, 1), 16))
    TM = max(TM, 16)
    if B < TM:                            # tiny batch: pad a handful of rows
        pad = TM - B
        belief = jnp.pad(belief, ((0, pad), (0, 0)))
        state = jnp.pad(state, ((0, pad), (0, 0)))
    num_tiles = -(-max(B, TM) // TM)      # ragged last block when B % TM != 0

    def const(shape):                     # resident weight/bias blocks
        return pl.BlockSpec(shape, lambda i: (0, 0))

    out = pl.pallas_call(
        _reward_kernel,
        out_shape=jax.ShapeDtypeStruct((num_tiles, 1, TM), jnp.float32),
        grid=(num_tiles,),
        in_specs=[
            pl.BlockSpec((TM, belief_size), lambda i: (i, 0)),   # belief tile
            pl.BlockSpec((TM, state_size), lambda i: (i, 0)),    # state tile
            const((belief_size, H)),                             # w1[:bs]
            const((state_size, H)),                              # w1[bs:]
            const((1, H)),                                       # b1 (f32)
            const((H, H)),                                       # w2
            const((1, H)),                                       # b2 (f32)
            const((1, H)),                                       # w3 row (f32)
            pl.BlockSpec(memory_space=pltpu.MemorySpace.SMEM),   # b3 scalar
        ],
        out_specs=pl.BlockSpec((1, 1, TM), lambda i: (i, 0, 0)),
        compiler_params=pltpu.CompilerParams(
            dimension_semantics=("parallel",),
            vmem_limit_bytes=32 * 1024 * 1024),
    )(belief, state, w1b, w1s, b1, w2, b2, w3_row, b3_s)

    # (num_tiles, 1, TM) lane-dense slab -> flat -> drop ragged/pad tail.
    return out.reshape(num_tiles * TM)[:B]


def init_params(key, belief_size, state_size, hidden_size):
    """Deterministic synthetic params matching nn.Linear shapes.

    PyTorch nn.Linear(in, out) has weight (out, in); we store the transpose
    (in, out) so the kernel does x @ W directly.
    """
    din = belief_size + state_size
    k1, k2, k3, k4, k5, k6 = jax.random.split(key, 6)
    scale = 0.1
    return {
        "w1": scale * jax.random.normal(k1, (din, hidden_size), jnp.float32),
        "b1": scale * jax.random.normal(k2, (1, hidden_size), jnp.float32),
        "w2": scale * jax.random.normal(k3, (hidden_size, hidden_size), jnp.float32),
        "b2": scale * jax.random.normal(k4, (1, hidden_size), jnp.float32),
        "w3": scale * jax.random.normal(k5, (hidden_size, 1), jnp.float32),
        "b3": scale * jax.random.normal(k6, (1, 1), jnp.float32),
    }


def reference_forward(belief, state, params, compute_dtype=jnp.float32):
    """Pure-JAX reference using the same precision policy as the kernel."""
    cd = compute_dtype
    x = jnp.concatenate([belief.astype(cd), state.astype(cd)], axis=1)
    h = jnp.dot(x, params["w1"].astype(cd), preferred_element_type=jnp.float32)
    h = jnp.maximum(h + params["b1"], 0.0)
    h = jnp.dot(h.astype(cd), params["w2"].astype(cd),
                preferred_element_type=jnp.float32)
    h = jnp.maximum(h + params["b2"], 0.0)
    r = jnp.dot(h, params["w3"], preferred_element_type=jnp.float32)
    return (r + params["b3"])[:, 0]


if __name__ == "__main__":
    # config: belief_size=32, state_size=16, hidden_size=32, batch=8
    belief_size, state_size, hidden_size, batch = 32, 16, 32, 8

    key = jax.random.PRNGKey(0)
    kp, kb, ks = jax.random.split(key, 3)
    params = init_params(kp, belief_size, state_size, hidden_size)
    belief = jax.random.normal(kb, (batch, belief_size), jnp.float32)
    state = jax.random.normal(ks, (batch, state_size), jnp.float32)

    # 1) f32 path, tiny batch (single tile) vs. exact f32 reference.
    reward = reward_model_forward(belief, state, params,
                                  compute_dtype=jnp.float32)
    jax.block_until_ready(reward)
    ref = reference_forward(belief, state, params, jnp.float32)
    assert reward.shape == (batch,), reward.shape
    assert jnp.allclose(reward, ref, atol=1e-5, rtol=1e-5), (reward, ref)

    # 2) default bf16 path, gridded with a ragged last block (B % TM != 0),
    #    vs. a reference using the same precision policy (bf16 in, f32 acc).
    big_b = 300
    kb2, ks2 = jax.random.split(jax.random.PRNGKey(1), 2)
    belief2 = jax.random.normal(kb2, (big_b, belief_size), jnp.float32)
    state2 = jax.random.normal(ks2, (big_b, state_size), jnp.float32)
    reward2 = reward_model_forward(belief2, state2, params)
    jax.block_until_ready(reward2)
    ref2 = reference_forward(belief2, state2, params, jnp.bfloat16)
    assert reward2.shape == (big_b,), reward2.shape
    assert jnp.allclose(reward2, ref2, atol=1e-4, rtol=1e-3), (
        float(jnp.max(jnp.abs(reward2 - ref2))))

    print("KERNEL_OK")
</pallas_src>

<mosaic_0001>
module attributes {stable_mosaic.version = 11 : i64} {
  func.func @_reward_kernel(%arg0: i32, %arg1: memref<16x32xf32, #tpu.memory_space<vmem>>, %arg2: memref<16x16xf32, #tpu.memory_space<vmem>>, %arg3: memref<32x32xf32, #tpu.memory_space<vmem>>, %arg4: memref<16x32xf32, #tpu.memory_space<vmem>>, %arg5: memref<1x32xf32, #tpu.memory_space<vmem>>, %arg6: memref<32x32xf32, #tpu.memory_space<vmem>>, %arg7: memref<1x32xf32, #tpu.memory_space<vmem>>, %arg8: memref<1x32xf32, #tpu.memory_space<vmem>>, %arg9: memref<1xf32, #tpu.memory_space<smem>>, %arg10: memref<1x1x16xf32, #tpu.memory_space<vmem>>) attributes {dimension_semantics = [#tpu.dimension_semantics<parallel>], iteration_bounds = array<i64: 1>, scalar_prefetch = 0 : i64, scratch_operands = 0 : i64, tpu.core_type = #tpu.core_type<tc>, window_params = [{transform_indices = @transform_0, window_bounds = array<i64: 16, 32>}, {transform_indices = @transform_1, window_bounds = array<i64: 16, 16>}, {pipeline_mode = #tpu.pipeline_mode<synchronous>, transform_indices = @transform_2, window_bounds = array<i64: 32, 32>}, {pipeline_mode = #tpu.pipeline_mode<synchronous>, transform_indices = @transform_3, window_bounds = array<i64: 16, 32>}, {pipeline_mode = #tpu.pipeline_mode<synchronous>, transform_indices = @transform_4, window_bounds = array<i64: 1, 32>}, {pipeline_mode = #tpu.pipeline_mode<synchronous>, transform_indices = @transform_5, window_bounds = array<i64: 32, 32>}, {pipeline_mode = #tpu.pipeline_mode<synchronous>, transform_indices = @transform_6, window_bounds = array<i64: 1, 32>}, {pipeline_mode = #tpu.pipeline_mode<synchronous>, transform_indices = @transform_7, window_bounds = array<i64: 1, 32>}, {transform_indices = @transform_8, window_bounds = array<i64: 1>}, {transform_indices = @transform_9, window_bounds = array<i64: 1, 1, 16>}]} {
    %c0 = arith.constant 0 : index
    %c0_0 = arith.constant 0 : index
    %0 = vector.load %arg1[%c0, %c0_0] : memref<16x32xf32, #tpu.memory_space<vmem>>, vector<16x32xf32>
    %c0_1 = arith.constant 0 : index
    %c0_2 = arith.constant 0 : index
    %1 = vector.load %arg3[%c0_1, %c0_2] : memref<32x32xf32, #tpu.memory_space<vmem>>, vector<32x32xf32>
    %cst = arith.constant dense<0.000000e+00> : vector<16x32xf32>
    %2 = tpu.matmul %0, %1, %cst {dimension_numbers = #tpu.dot_dimension_numbers<[1], [0], [0], [1], [0, 0, 1, 1], [], []>} : vector<16x32xf32>, vector<32x32xf32>, vector<16x32xf32> -> vector<16x32xf32>
    %c0_3 = arith.constant 0 : index
    %c0_4 = arith.constant 0 : index
    %3 = vector.load %arg2[%c0_3, %c0_4] : memref<16x16xf32, #tpu.memory_space<vmem>>, vector<16x16xf32>
    %c0_5 = arith.constant 0 : index
    %c0_6 = arith.constant 0 : index
    %4 = vector.load %arg4[%c0_5, %c0_6] : memref<16x32xf32, #tpu.memory_space<vmem>>, vector<16x32xf32>
    %cst_7 = arith.constant dense<0.000000e+00> : vector<16x32xf32>
    %5 = tpu.matmul %3, %4, %cst_7 {dimension_numbers = #tpu.dot_dimension_numbers<[1], [0], [0], [1], [0, 0, 1, 1], [], []>} : vector<16x16xf32>, vector<16x32xf32>, vector<16x32xf32> -> vector<16x32xf32>
    %6 = arith.addf %2, %5 : vector<16x32xf32>
    %c0_8 = arith.constant 0 : index
    %c0_9 = arith.constant 0 : index
    %7 = vector.load %arg5[%c0_8, %c0_9] : memref<1x32xf32, #tpu.memory_space<vmem>>, vector<1x32xf32>
    %8 = vector.broadcast %7 : vector<1x32xf32> to vector<16x32xf32>
    %9 = arith.addf %6, %8 : vector<16x32xf32>
    %cst_10 = arith.constant 0.000000e+00 : f32
    %10 = vector.broadcast %cst_10 : f32 to vector<16x32xf32>
    %11 = arith.maximumf %9, %10 : vector<16x32xf32>
    %c0_11 = arith.constant 0 : index
    %c0_12 = arith.constant 0 : index
    %12 = vector.load %arg6[%c0_11, %c0_12] : memref<32x32xf32, #tpu.memory_space<vmem>>, vector<32x32xf32>
    %cst_13 = arith.constant dense<0.000000e+00> : vector<16x32xf32>
    %13 = tpu.matmul %11, %12, %cst_13 {dimension_numbers = #tpu.dot_dimension_numbers<[1], [0], [0], [1], [0, 0, 1, 1], [], []>} : vector<16x32xf32>, vector<32x32xf32>, vector<16x32xf32> -> vector<16x32xf32>
    %c0_14 = arith.constant 0 : index
    %c0_15 = arith.constant 0 : index
    %14 = vector.load %arg7[%c0_14, %c0_15] : memref<1x32xf32, #tpu.memory_space<vmem>>, vector<1x32xf32>
    %15 = vector.broadcast %14 : vector<1x32xf32> to vector<16x32xf32>
    %16 = arith.addf %13, %15 : vector<16x32xf32>
    %cst_16 = arith.constant 0.000000e+00 : f32
    %17 = vector.broadcast %cst_16 : f32 to vector<16x32xf32>
    %18 = arith.maximumf %16, %17 : vector<16x32xf32>
    %c0_17 = arith.constant 0 : index
    %c0_18 = arith.constant 0 : index
    %19 = vector.load %arg8[%c0_17, %c0_18] : memref<1x32xf32, #tpu.memory_space<vmem>>, vector<1x32xf32>
    %20 = tpu.transpose %18, [1, 0] : vector<16x32xf32> -> vector<32x16xf32>
    %cst_19 = arith.constant dense<0.000000e+00> : vector<1x16xf32>
    %21 = tpu.matmul %19, %20, %cst_19 {dimension_numbers = #tpu.dot_dimension_numbers<[1], [0], [0], [1], [0, 0, 1, 1], [], []>} : vector<1x32xf32>, vector<32x16xf32>, vector<1x16xf32> -> vector<1x16xf32>
    %c0_20 = arith.constant 0 : index
    %22 = memref.load %arg9[%c0_20] : memref<1xf32, #tpu.memory_space<smem>>
    %23 = vector.broadcast %22 : f32 to vector<1x16xf32>
    %24 = arith.addf %21, %23 : vector<1x16xf32>
    %25 = vector.shape_cast %24 : vector<1x16xf32> to vector<1x1x16xf32>
    %c0_21 = arith.constant 0 : index
    %c0_22 = arith.constant 0 : index
    %c0_23 = arith.constant 0 : index
    %26 = vector.load %arg10[%c0_21, %c0_22, %c0_23] : memref<1x1x16xf32, #tpu.memory_space<vmem>>, vector<1x1x16xf32>
    tpu.vector_store %arg10[%c0_21, %c0_22, %c0_23], %25 {strides = array<i32>} : memref<1x1x16xf32, #tpu.memory_space<vmem>>, vector<1x1x16xf32>,
    return
  }
  func.func @transform_0(%arg0: i32) -> (i32, i32) {
    %c0_i32 = arith.constant 0 : i32
    %c0_i32_0 = arith.constant 0 : i32
    return %arg0, %c0_i32 : i32, i32
  }
  func.func @transform_1(%arg0: i32) -> (i32, i32) {
    %c0_i32 = arith.constant 0 : i32
    %c0_i32_0 = arith.constant 0 : i32
    return %arg0, %c0_i32 : i32, i32
  }
  func.func @transform_2(%arg0: i32) -> (i32, i32) {
    %c0_i32 = arith.constant 0 : i32
    %c0_i32_0 = arith.constant 0 : i32
    %c0_i32_1 = arith.constant 0 : i32
    return %c0_i32, %c0_i32_0 : i32, i32
  }
  func.func @transform_3(%arg0: i32) -> (i32, i32) {
    %c0_i32 = arith.constant 0 : i32
    %c0_i32_0 = arith.constant 0 : i32
    %c0_i32_1 = arith.constant 0 : i32
    return %c0_i32, %c0_i32_0 : i32, i32
  }
  func.func @transform_4(%arg0: i32) -> (i32, i32) {
    %c0_i32 = arith.constant 0 : i32
    %c0_i32_0 = arith.constant 0 : i32
    %c0_i32_1 = arith.constant 0 : i32
    return %c0_i32, %c0_i32_0 : i32, i32
  }
  func.func @transform_5(%arg0: i32) -> (i32, i32) {
    %c0_i32 = arith.constant 0 : i32
    %c0_i32_0 = arith.constant 0 : i32
    %c0_i32_1 = arith.constant 0 : i32
    return %c0_i32, %c0_i32_0 : i32, i32
  }
  func.func @transform_6(%arg0: i32) -> (i32, i32) {
    %c0_i32 = arith.constant 0 : i32
    %c0_i32_0 = arith.constant 0 : i32
    %c0_i32_1 = arith.constant 0 : i32
    return %c0_i32, %c0_i32_0 : i32, i32
  }
  func.func @transform_7(%arg0: i32) -> (i32, i32) {
    %c0_i32 = arith.constant 0 : i32
    %c0_i32_0 = arith.constant 0 : i32
    %c0_i32_1 = arith.constant 0 : i32
    return %c0_i32, %c0_i32_0 : i32, i32
  }
  func.func @transform_8(%arg0: i32) -> i32 {
    %c0_i32 = arith.constant 0 : i32
    %c0_i32_0 = arith.constant 0 : i32
    return %c0_i32 : i32
  }
  func.func @transform_9(%arg0: i32) -> (i32, i32, i32) {
    %c0_i32 = arith.constant 0 : i32
    %c0_i32_0 = arith.constant 0 : i32
    %c0_i32_1 = arith.constant 0 : i32
    return %arg0, %c0_i32, %c0_i32_0 : i32, i32, i32
  }
}

</mosaic_0001>

<bundles_post_ra>
// kernel: tpu_custom_call.1
= control target key start
LH: loop header
LB: loop body
LE: loop exit
PB: predicated region body
PF: predicated region fallthrough
CT: control target
= control target key end

     0   :  { %15 = vsyncpa [#allocation4], 0  ;;  %s908_s0 = inlined_call_operand.hbm [shape: f32[16,32], index: 0, kind: input, shape index: {}]   ;;  %s909_s1 = inlined_call_operand.hbm [shape: f32[16,16], index: 1, kind: input, shape index: {}]   ;;  %s910_s2 = inlined_call_operand.hbm [shape: f32[32,32], index: 2, kind: input, shape index: {}]   ;;  %s911_s3 = inlined_call_operand.hbm [shape: f32[16,32], index: 3, kind: input, shape index: {}]   ;;  %s912_s4 = inlined_call_operand.vmem [shape: f32[1,32], index: 4, kind: input, shape index: {}]   ;;  %s913_s5 = inlined_call_operand.hbm [shape: f32[32,32], index: 5, kind: input, shape index: {}]   ;;  %s914_s6 = inlined_call_operand.vmem [shape: f32[1,32], index: 6, kind: input, shape index: {}]   ;;  %s915_s7 = inlined_call_operand.vmem [shape: f32[1,32], index: 7, kind: input, shape index: {}]   ;;  %s916_s8 = inlined_call_operand.<no memory space> [shape: f32[1], index: 8, kind: input, shape index: {}]   ;;  %s917_s9 = inlined_call_operand.hbm [shape: f32[1,1,16], index: 9, kind: output, shape index: {}]  }
   0x1   :  { %16 = vsyncpa [#allocation7], 0 }
   0x2   :  { %17 = vsyncpa [#allocation10], 0 }
   0x3   :  { %18 = vsyncpa [#allocation5], 0  ;;  %s725_s30 = smov [#allocation6]   ;;  %s726_s11 = smov [#allocation9]  }
   0x4   :  { %s36_s10 = sshll.u32 %s725_s30, 4  ;;  %s60_s12 = sshll.u32 %s726_s11, 4  ;;  %s37_s10 = int_to_ptr.vmem [resolvable:$true] %s36_s10  ;;  %s786_s12 = int_to_ptr.vmem [resolvable:$true] %s60_s12 }
   0x5   :  { %s585_s15 = scalar_lea.hbm %s909_s1, 256 }
   0x6   :  { %p586_p0 = scmp.ne.s32.totalorder %s909_s1, %s585_s15  ;;  %p589_p1 = scmp.lt.u32.totalorder %s585_s15, %s909_s1 }
   0x8   :  { %p591_p2 = pnand %p589_p1, %p586_p0 }
   0xa   :  { %594 = shalt.err (!%p591_p2)
}
   0xb   :  { %s595_s20 = scalar_lea.vmem %s37_s10, 256  ;;  %p600_p4 = scmp.lt.s32.totalorder %s37_s10, %s37_s10 }
   0xc   :  { %p596_p3 = scmp.ne.s32.totalorder %s37_s10, %s595_s20  ;;  %p601_p5 = scmp.lt.s32.totalorder %s595_s20, %s595_s20 }
   0xe   :  { %p602_p6 = por %p601_p5, %p600_p4 }
  0x10   :  { %p603_p7 = pnand %p602_p6, %p596_p3 }
  0x12   :  { %606 = shalt.err (!%p603_p7)
}
  0x13   :  { %s727_s21 = smov 128   ;;  %s728_s22 = smov 8  }
  0x14   :  { %42 = dma.hbm_to_vmem [thread:$0]  %s909_s1, 256, %s37_s10, [#allocation7], %s727_s21, %s727_s21, %s728_s22  }
  0x15   :  { %s607_s27 = scalar_lea.hbm %s911_s3, 256 }
  0x16   :  { %p608_p8 = scmp.ne.s32.totalorder %s911_s3, %s607_s27  ;;  %p611_p9 = scmp.lt.u32.totalorder %s607_s27, %s911_s3 }
  0x18   :  { %p613_p10 = pnand %p611_p9, %p608_p8 }
  0x1a   :  { %616 = shalt.err (!%p613_p10)
}
  0x1b   :  { %s617_s13 = scalar_lea.vmem %s786_s12, 256  ;;  %p622_p12 = scmp.lt.s32.totalorder %s786_s12, %s786_s12 }
  0x1c   :  { %p618_p11 = scmp.ne.s32.totalorder %s786_s12, %s617_s13  ;;  %p623_p13 = scmp.lt.s32.totalorder %s617_s13, %s617_s13 }
  0x1e   :  { %p624_p0 = por %p623_p13, %p622_p12 }
  0x20   :  { %p625_p1 = pnand %p624_p0, %p618_p11 }
  0x22   :  { %628 = shalt.err (!%p625_p1)
}
  0x23   :  { %66 = dma.hbm_to_vmem [thread:$0]  %s911_s3, 256, %s786_s12, [#allocation10], %s727_s21, %s727_s21, %s728_s22  }
  0x24   :  { %s729_s14 = smov [#allocation3]   ;;  %s730_s16 = smov [#allocation8]  }
  0x25   :  { %s24_s15 = sshll.u32 %s729_s14, 4  ;;  %s48_s17 = sshll.u32 %s730_s16, 4  ;;  %s25_s15 = int_to_ptr.vmem [resolvable:$true] %s24_s15  ;;  %s823_s17 = int_to_ptr.vmem [resolvable:$true] %s48_s17 }
  0x26   :  { %s629_s20 = scalar_lea.hbm %s908_s0, 256 }
  0x27   :  { %p630_p2 = scmp.ne.s32.totalorder %s908_s0, %s629_s20  ;;  %p633_p3 = scmp.lt.u32.totalorder %s629_s20, %s908_s0 }
  0x29   :  { %p635_p4 = pnand %p633_p3, %p630_p2 }
  0x2b   :  { %638 = shalt.err (!%p635_p4)
}
  0x2c   :  { %s639_s3 = scalar_lea.vmem %s25_s15, 256  ;;  %p644_p6 = scmp.lt.s32.totalorder %s25_s15, %s25_s15 }
  0x2d   :  { %p640_p5 = scmp.ne.s32.totalorder %s25_s15, %s639_s3  ;;  %p645_p7 = scmp.lt.s32.totalorder %s639_s3, %s639_s3 }
  0x2f   :  { %p646_p8 = por %p645_p7, %p644_p6 }
  0x31   :  { %p647_p9 = pnand %p646_p8, %p640_p5 }
  0x33   :  { %650 = shalt.err (!%p647_p9)
}
  0x34   :  { %30 = dma.hbm_to_vmem [thread:$0]  %s908_s0, 256, %s25_s15, [#allocation4], %s727_s21, %s727_s21, %s728_s22  }
  0x35   :  { %s651_s30 = scalar_lea.hbm %s910_s2, 512 }
  0x36   :  { %p652_p10 = scmp.ne.s32.totalorder %s910_s2, %s651_s30  ;;  %p655_p11 = scmp.lt.u32.totalorder %s651_s30, %s910_s2 }
  0x38   :  { %p657_p12 = pnand %p655_p11, %p652_p10 }
  0x3a   :  { %660 = shalt.err (!%p657_p12)
}
  0x3b   :  { %s661_s14 = scalar_lea.vmem %s823_s17, 512  ;;  %p666_p0 = scmp.lt.s32.totalorder %s823_s17, %s823_s17 }
  0x3c   :  { %p662_p13 = scmp.ne.s32.totalorder %s823_s17, %s661_s14  ;;  %p667_p1 = scmp.lt.s32.totalorder %s661_s14, %s661_s14 }
  0x3e   :  { %p668_p2 = por %p667_p1, %p666_p0 }
  0x40   :  { %p669_p3 = pnand %p668_p2, %p662_p13 }
  0x42   :  { %672 = shalt.err (!%p669_p3)
}
  0x43   :  { %54 = dma.hbm_to_vmem [thread:$0]  %s910_s2, 512, %s823_s17, [#allocation7], %s727_s21, %s727_s21, %s728_s22  }
  0x44   :  { %s731_s16 = smov [#allocation11]   ;;  %s673_s23 = scalar_lea.hbm %s913_s5, 512 }
  0x45   :  { %s74_s18 = sshll.u32 %s731_s16, 4  ;;  %p674_p4 = scmp.ne.s32.totalorder %s913_s5, %s673_s23  ;;  %s75_s18 = int_to_ptr.vmem [resolvable:$true] %s74_s18 }
  0x46   :  { %p677_p5 = scmp.lt.u32.totalorder %s673_s23, %s913_s5 }
  0x48   :  { %p679_p6 = pnand %p677_p5, %p674_p4 }
  0x4a   :  { %682 = shalt.err (!%p679_p6)
}
  0x4b   :  { %s683_s12 = scalar_lea.vmem %s75_s18, 512  ;;  %p688_p8 = scmp.lt.s32.totalorder %s75_s18, %s75_s18 }
  0x4c   :  { %p684_p7 = scmp.ne.s32.totalorder %s75_s18, %s683_s12  ;;  %p689_p9 = scmp.lt.s32.totalorder %s683_s12, %s683_s12 }
  0x4e   :  { %p690_p10 = por %p689_p9, %p688_p8 }
  0x50   :  { %p691_p11 = pnand %p690_p10, %p684_p7 }
  0x52   :  { %694 = shalt.err (!%p691_p11)
}
  0x53   :  { %80 = dma.hbm_to_vmem [thread:$0]  %s913_s5, 512, %s75_s18, [#allocation10], %s727_s21, %s727_s21, %s728_s22  }
  0x54   :  { %717 = dma.done.wait [#allocation4], 256  }
  0x55   :  { %718 = vsyncadd [#allocation4], 4294967040 }
  0x56   :  { %719 = dma.done.wait [#allocation7], 768  }
  0x57   :  { %720 = vsyncadd [#allocation7], 4294966528 }
  0x58   :  { %721 = dma.done.wait [#allocation10], 768  }
  0x59   :  { %722 = vsyncadd [#allocation10], 4294966528  ;;  %vm112_vm0 = vcmask 130048   ;;  %v110_v0 = vld [vmem:[#allocation9] sm:$0xff]  ;;  %v111_v1 = vld [vmem:[#allocation9 + $0x8] sm:$0xff]  ;;  %vm194_vm1 = vcmask 261120   ;;  %v383_v37 = vstv %s916_s8 }
  0x5a   :  { %v108_v2 = vld [vmem:[#allocation6] sm:$0xff]  ;;  %v548_v3 = vpack.c.bf16 %v111_v1, %v110_v0  ;;  %v104_v4 = vld [vmem:[#allocation8] sm:$0xff]  ;;  %v105_v5 = vld [vmem:[#allocation8 + $0x8] sm:$0xff]  ;;  %v732_v26 = vmov 0.0|0.0   ;;  %vm733_vm2 = vmmov 0   ;;  %v734_v27 = vmov 0.0  }
  0x5b   :  { %516 = vmatprep.mubr.msk.f32.mxu0 %vm112_vm0, %v108_v2  ;;  %v552_v6 = vpack.c.bf16 %v105_v5, %v104_v4  ;;  %v106_v7 = vld [vmem:[#allocation8 + $0x10] sm:$0xff]  ;;  %v107_v8 = vld [vmem:[#allocation8 + $0x18] sm:$0xff]  ;;  %v102_v14 = vld [vmem:[#allocation3] sm:$0xff]  ;;  %vm463_vm4 = vcmask 122880  }
  0x5c   :  { %549 = vmatprep.subr.bf16.mxu0 %v548_v3  ;;  %v287_v9 = vld [vmem:[#allocation11] sm:$0xff]  ;;  %v288_v10 = vld [vmem:[#allocation11 + $0x8] sm:$0xff]  ;;  %v556_v13 = vpack.c.bf16 %v107_v8, %v106_v7  ;;  %v103_v15 = vld [vmem:[#allocation3 + $0x8] sm:$0xff] }
  0x5d   :  { %551 = vmatpush3.bf16.msra.mxu0 %v548_v3  ;;  %v109_v11 = vld [vmem:[#allocation6 + $0x8] sm:$0xff]  ;;  %v560_v12 = vpack.c.bf16 %v288_v10, %v287_v9  ;;  %v289_v16 = vld [vmem:[#allocation11 + $0x10] sm:$0xff]  ;;  %v290_v17 = vld [vmem:[#allocation11 + $0x18] sm:$0xff] }
  0x5e   :  { %553 = vmatprep.subr.bf16.mxu0 %v552_v6  ;;  %v564_v18 = vpack.c.bf16 %v290_v17, %v289_v16  ;;  %v486_v19 = vld [vmem:[%s912_s4] ss:$0 sm:$0xff]  ;;  %vm570_vm3 = vmpackc.low %vm194_vm1, %vm194_vm1 }
  0x5f   :  { %561 = vmatprep.subr.bf16.mxu1 %v560_v12  ;;  %v487_v28 = vld [vmem:[%s914_s6] ss:$0 sm:$0xff]  ;;  %s735_s6 = smov [#allocation12]  }
  0x60   :  { %517 = vmatmul.mubr.msk.f32.vlgmr.msra.gmra.mrb[0].mxu0 %vm112_vm0, %v109_v11  ;;  %563 = vmatpush3.bf16.msra.mxu1 %v560_v12  ;;  %v381_v36 = vld [vmem:[%s915_s7] sm:$0x1]  ;;  %s471_s11 = sshll.u32 %s735_s6, 4  ;;  %s472_s11 = int_to_ptr.vmem [resolvable:$true] %s471_s11 }
  0x61   :  { %555 = vmatpush3.bf16.msra.mxu0 %v552_v6  ;;  %527 = vmatprep.mubr.msk.f32.mxu0 %vm194_vm1, %v102_v14  ;;  %s695_s13 = scalar_lea.vmem %s472_s11, 16  ;;  %s699_s1 = scalar_lea.vmem %s472_s11, 32 }
  0x62   :  { %557 = vmatprep.subr.bf16.mxu0 %v556_v13  ;;  %565 = vmatprep.subr.bf16.mxu1 %v564_v18  ;;  %p696_p12 = scmp.ne.s32.totalorder %s472_s11, %s695_s13  ;;  %p700_p13 = scmp.lt.s32.totalorder %s472_s11, %s472_s11 }
  0x63   :  { %p701_p0 = scmp.lt.s32.totalorder %s699_s1, %s695_s13 }
  0x64   :  { %567 = vmatpush3.bf16.msra.mxu1 %v564_v18 }
  0x65   :  { %559 = vmatpush3.bf16.msra.mxu0 %v556_v13  ;;  %568 = vmatprep.subr.bf16.mxu1 %v732_v26  ;;  %p702_p1 = por %p701_p0, %p700_p13 }
  0x67   :  { %p703_p2 = pnand %p702_p1, %p696_p12 }
  0x68   :  { %528 = vmatmul.mubr.msk.f32.vlgmr.msra.gmra.mrb[0].mxu0 %vm194_vm1, %v103_v15 }
 0x13b   :  { %v529_v20 = vpop.f32.mrb[0].mxu0 }
 0x13c   :  { %v284_v21 = vadd.f32 %v529_v20, %v486_v19  ;;  %v267_v22 = vpop.f32.mrb[1].mxu0 }
 0x13d   :  { %v283_v23 = vadd.f32 %v486_v19, %v267_v22 }
 0x13e   :  { %v286_v25 = vmax.f32 %v284_v21, 0.0 }
 0x13f   :  { %v285_v24 = vmax.f32 %v283_v23, 0.0 }
 0x141   :  { %538 = vmatprep.mubr.msk.f32.mxu1 %vm194_vm1, %v285_v24 }
 0x142   :  { %539 = vmatmul.mubr.msk.f32.vlgmr.msra.gmra.mrb[0].mxu1 %vm194_vm1, %v286_v25 }
 0x143   :  { %545 = vmatprep.mubr.msk.f32.mxu1 %vm733_vm2, %v734_v27 }
 0x215   :  { %v540_v29 = vpop.f32.mrb[0].mxu1 }
 0x216   :  { %v376_v30 = vadd.f32 %v540_v29, %v487_v28  ;;  %v370_v31 = vpop.f32.mrb[1].mxu1 }
 0x217   :  { %v371_v32 = vadd.f32 %v487_v28, %v370_v31 }
 0x218   :  { %v380_v33 = vmax.f32 %v376_v30, 0.0 }
 0x219   :  { %v379_v34 = vmax.f32 %v371_v32, 0.0 }
 0x21b   :  { %v569_v35 = vpack.c.bf16 %v380_v33, %v379_v34 }
 0x21d   :  { %571 = vmatpush3.bf16.xpose.msk.msra.mxu1 %vm570_vm3, %v569_v35 }
 0x224   :  { %546 = vmatmul.mubr.msk.f32.vlgmr.msra.gmra.mrb[2].mxu1 %vm194_vm1, %v381_v36 }
 0x2f7   :  { %v459_v38 = vpop.f32.mrb[2].mxu1 }
 0x2f8   :  { %v460_v39 = vadd.f32 %v459_v38, %v383_v37  ;;  %v547_v40 = vpop.f32.mrb[3].mxu1 }
 0x2fa   :  { %464 = vst.msk [vmem:[#allocation12] sm:$0x1] %vm463_vm4, %v460_v39 }
 0x2fb   :  { %706 = shalt.err (!%p703_p2)
}
 0x2fc   :  { %s707_s8 = scalar_lea.hbm %s917_s9, 16 }
 0x2fd   :  { %p708_p3 = scmp.ne.s32.totalorder %s917_s9, %s707_s8  ;;  %p711_p4 = scmp.lt.u32.totalorder %s707_s8, %s917_s9 }
 0x2ff   :  { %p713_p5 = pnand %p711_p4, %p708_p3 }
 0x301   :  { %716 = shalt.err (!%p713_p5)
}
 0x302   :  { %474 = dma.vmem_to_hbm [thread:$0]  %s472_s11, 16, %s917_s9, [#allocation5]  }
 0x303   :  { %723 = dma.done.wait [#allocation5], 16  }
 0x304   :  { %724 = vsyncadd [#allocation5], 4294967280 }
 0x305   :  { %478 = vsyncpa [#allocation4], 1 }
 0x306   :  { %479 = vsyncpa [#allocation7], 1 }
 0x307   :  { %480 = vsyncpa [#allocation10], 1 }
 0x308   :  { %481 = vsyncpa [#allocation5], 1 }

</bundles_post_ra>
